<compile_context>
chip_gen: v7x
topology: tpu7x:2x2x1
jax: 0.10.0
libtpu: 0.0.40
codegen_flags: <defaults>
</compile_context>

<pallas_src>
import functools

import jax
import jax.numpy as jnp
from jax.experimental import pallas as pl
from jax.experimental.pallas import tpu as pltpu


# --------------------------------------------------------------------------- #
# Kernel
# --------------------------------------------------------------------------- #
def _lm_head_kernel(x_ref, gamma_ref, beta_ref, w_ref, o_ref, *, eps):
    # x_ref:     (tm, D)   rows of the flattened activations
    # gamma_ref: (1, D)    LayerNorm weight
    # beta_ref:  (1, D)    LayerNorm bias
    # w_ref:     (D, tn)   linear weight tile, pre-transposed in the wrapper
    # o_ref:     (tm, tn)  output logits tile
    #
    # LayerNorm (f32 stats) recomputed per tile: negligible VPU cost relative
    # to the (tm, D) x (D, tn) matmul, and keeps the kernel state-free so both
    # grid axes may be iterated in any order / sharded across cores.
    x = x_ref[...].astype(jnp.float32)
    mean = jnp.mean(x, axis=-1, keepdims=True)
    xc = x - mean
    var = jnp.mean(xc * xc, axis=-1, keepdims=True)
    inv = jax.lax.rsqrt(var + eps)
    normed = xc * inv * gamma_ref[...].astype(jnp.float32) + beta_ref[...].astype(
        jnp.float32
    )

    # Plain (tm, D) @ (D, tn) on the MXU; operands in the weight dtype
    # (bf16-native when bf16/cast weights), accumulation forced to f32.
    o_ref[...] = jnp.dot(
        normed.astype(w_ref.dtype),
        w_ref[...],
        preferred_element_type=jnp.float32,
    ).astype(o_ref.dtype)


# --------------------------------------------------------------------------- #
# Hardware detection & tile selection
# --------------------------------------------------------------------------- #
_GEN_DEFAULTS = {
    #          tm_pref tn_pref  tm_aligns       tn_aligns     vmem_fallback
    "v5e": dict(tm=384, tn=512, tma=(128, 16, 8), tna=(128,),      vmem=128 << 20),
    "v6e": dict(tm=768, tn=512, tma=(256, 16, 8), tna=(256, 128),  vmem=128 << 20),
    "v7x": dict(tm=512, tn=512, tma=(256, 16, 8), tna=(256, 128),  vmem=64 << 20),
    "unknown": dict(tm=256, tn=512, tma=(128, 16, 8), tna=(128,),  vmem=64 << 20),
}


def _detect_tpu():
    """Return (generation_key, vmem_capacity_bytes); conservative on failure."""
    kind = ""
    try:
        kind = jax.devices()[0].device_kind.lower()
    except Exception:
        pass
    if "v7" in kind:
        gen = "v7x"
    elif "v6" in kind:
        gen = "v6e"
    elif "v5" in kind:
        gen = "v5e"
    else:
        gen = "unknown"
    vmem = None
    try:
        info = pltpu.get_tpu_info()
        vmem = int(getattr(info, "vmem_capacity_bytes"))
    except Exception:
        vmem = None
    if vmem is None or vmem <= 0:
        vmem = _GEN_DEFAULTS[gen]["vmem"]
    return gen, vmem


def _pick_tile(total, preferred, aligns):
    """Largest divisor of `total` that is <= `preferred` and a multiple of the
    first achievable alignment in `aligns` (tried in order). Falls back to the
    full extent (block_shape == array dim is always legal)."""
    if total <= preferred:
        return total
    for align in aligns:
        t = (preferred // align) * align
        while t >= align:
            if total % t == 0:
                return t
            t -= align
    return total


def _est_vmem_bytes(tm, tn, D, x_item, w_item, out_item):
    return (
        2 * tm * D * x_item      # x tile, double-buffered
        + 2 * D * tn * w_item    # weight tile, double-buffered
        + 2 * tm * tn * out_item # output tile, double-buffered
        + 4 * D * x_item         # gamma / beta
    )


def _fit_tiles(M, V, D, tm, tn, tma, tna, x_item, w_item, out_item, budget):
    """Shrink tm/tn (keeping them divisors of M/V) until the tile budget fits."""
    while _est_vmem_bytes(tm, tn, D, x_item, w_item, out_item) > budget:
        prev = (tm, tn)
        if tm * x_item >= tn * w_item and tm > tma[-1]:
            tm = _pick_tile(M, max(tm // 2, tma[-1]), tma)
        elif tn > 128:
            tn = _pick_tile(V, max(tn // 2, 128), tna)
        if (tm, tn) == prev:
            break  # cannot shrink further (small / awkward shapes)
    return tm, tn


# --------------------------------------------------------------------------- #
# Wrapper
# --------------------------------------------------------------------------- #
def transformer_lm_head(x, ln_weight, ln_bias, linear_weight, *, tm=None, tn=None,
                        eps=1e-5, cast_matmul_to_bf16=True):
    """x: (B, S, D); ln_weight/ln_bias: (D,); linear_weight: (V, D) PyTorch layout.

    Returns (B, S, V) logits = LayerNorm(x) @ linear_weight.T.
    """
    B, S, D = x.shape
    V, D_w = linear_weight.shape
    assert D_w == D
    M = B * S

    x2 = x.reshape(M, D)
    gamma = ln_weight.reshape(1, D)
    beta = ln_bias.reshape(1, D)

    # MXU operand dtype: bf16 operands + f32 accumulate for f32 checkpoints
    # (avoids emulated f32 matmul, halves the weight HBM stream).
    if linear_weight.dtype == jnp.float32 and cast_matmul_to_bf16:
        mm_dtype = jnp.bfloat16
    else:
        mm_dtype = linear_weight.dtype
    # One-time wrapper-side transpose + cast to (D, V): the kernel then runs a
    # plain (tm,D)@(D,tn) dot with no per-tile in-kernel transpose.
    w_t = linear_weight.astype(mm_dtype).T

    out_dtype = x.dtype
    x_item = jnp.dtype(x2.dtype).itemsize
    w_item = jnp.dtype(mm_dtype).itemsize
    out_item = jnp.dtype(out_dtype).itemsize

    # Generation-aware tiling + VMEM budgeting.
    gen, vmem_cap = _detect_tpu()
    cfg = _GEN_DEFAULTS[gen]
    budget = int(0.70 * vmem_cap)  # leave headroom for compiler scratch / semaphores

    if tm is None:
        tm = _pick_tile(M, cfg["tm"], cfg["tma"])
    if tn is None:
        tn = _pick_tile(V, cfg["tn"], cfg["tna"])
    tm, tn = _fit_tiles(M, V, D, tm, tn, cfg["tma"], cfg["tna"],
                        x_item, w_item, out_item, budget)
    assert M % tm == 0 and V % tn == 0

    est = _est_vmem_bytes(tm, tn, D, x_item, w_item, out_item)
    vmem_limit = max(int(1.3 * est), 32 * 1024 * 1024)
    vmem_limit = min(vmem_limit, vmem_cap - (2 << 20))  # never exceed physical VMEM
    vmem_limit = max(vmem_limit, est)

    cost = pl.CostEstimate(
        flops=2 * M * D * V,
        transcendentals=M,  # one rsqrt per row
        bytes_accessed=(
            M * D * x_item                      # x streamed once (resident across j)
            + V * D * w_item * (M // tm)        # weight re-streamed per row block
            + M * V * out_item                  # logits written once
        ),
    )

    kernel = functools.partial(_lm_head_kernel, eps=eps)

    out = pl.pallas_call(
        kernel,
        out_shape=jax.ShapeDtypeStruct((M, V), out_dtype),
        grid_spec=pltpu.PrefetchScalarGridSpec(
            num_scalar_prefetch=0,
            grid=(M // tm, V // tn),  # i = rows (outer), j = vocab (inner)
            in_specs=[
                pl.BlockSpec((tm, D), lambda i, j: (i, 0)),   # activation rows
                pl.BlockSpec((1, D), lambda i, j: (0, 0)),    # LN gamma
                pl.BlockSpec((1, D), lambda i, j: (0, 0)),    # LN beta
                pl.BlockSpec((D, tn), lambda i, j: (0, j)),   # pre-transposed weight
            ],
            out_specs=pl.BlockSpec((tm, tn), lambda i, j: (i, j)),
        ),
        compiler_params=pltpu.CompilerParams(
            # Kernel is state-free across grid steps, so both axes are safe to
            # shard across cores (v7x megacore can split the vocab axis on
            # small-M decode calls).
            dimension_semantics=("parallel", "parallel"),
            vmem_limit_bytes=int(vmem_limit),
        ),
        cost_estimate=cost,
    )(x2, gamma, beta, w_t)

    return out.reshape(B, S, V)


# --------------------------------------------------------------------------- #
# Reference & test
# --------------------------------------------------------------------------- #
def _reference(x, ln_weight, ln_bias, linear_weight, eps=1e-5):
    xf = x.astype(jnp.float32)
    mean = jnp.mean(xf, axis=-1, keepdims=True)
    var = jnp.mean((xf - mean) ** 2, axis=-1, keepdims=True)
    normed = (xf - mean) / jnp.sqrt(var + eps)
    normed = normed * ln_weight + ln_bias
    return normed @ linear_weight.T.astype(jnp.float32)


if __name__ == "__main__":
    key = jax.random.PRNGKey(0)
    B, S, D, V = 2, 8, 32, 128  # batch, seq, emb_dim, tgt_vocab_size

    k_x, k_w = jax.random.split(key)
    x = jax.random.normal(k_x, (B, S, D), dtype=jnp.float32)

    # Deterministic parameter init (mirrors nn.LayerNorm / nn.Linear shapes).
    ln_weight = jnp.ones((D,), dtype=jnp.float32)
    ln_bias = jnp.zeros((D,), dtype=jnp.float32)
    bound = 1.0 / (D ** 0.5)
    linear_weight = jax.random.uniform(
        k_w, (V, D), dtype=jnp.float32, minval=-bound, maxval=bound
    )

    ref = _reference(x, ln_weight, ln_bias, linear_weight)

    # 1) Full-precision MXU path (tight tolerance).
    out_f32 = transformer_lm_head(
        x, ln_weight, ln_bias, linear_weight, cast_matmul_to_bf16=False
    )
    out_f32 = jax.block_until_ready(out_f32)
    assert out_f32.shape == (B, S, V)
    assert jnp.allclose(out_f32, ref, atol=1e-4, rtol=1e-4), "f32 path mismatch"

    # 2) Default path: bf16 MXU operands, f32 accumulation (looser tolerance).
    out_bf16 = transformer_lm_head(x, ln_weight, ln_bias, linear_weight)
    out_bf16 = jax.block_until_ready(out_bf16)
    assert out_bf16.shape == (B, S, V)
    assert jnp.allclose(out_bf16, ref, atol=2e-2, rtol=2e-2), "bf16 path mismatch"

    print("KERNEL_OK")
</pallas_src>

<mosaic_0001>
module attributes {stable_mosaic.version = 11 : i64} {
  func.func @_lm_head_kernel(%arg0: i32, %arg1: i32, %arg2: memref<16x32xf32, #tpu.memory_space<vmem>>, %arg3: memref<1x32xf32, #tpu.memory_space<vmem>>, %arg4: memref<1x32xf32, #tpu.memory_space<vmem>>, %arg5: memref<32x128xf32, #tpu.memory_space<vmem>>, %arg6: memref<16x128xf32, #tpu.memory_space<vmem>>) attributes {dimension_semantics = [#tpu.dimension_semantics<parallel>, #tpu.dimension_semantics<parallel>], iteration_bounds = array<i64: 1, 1>, scalar_prefetch = 0 : i64, scratch_operands = 0 : i64, tpu.core_type = #tpu.core_type<tc>, window_params = [{transform_indices = @transform_0, window_bounds = array<i64: 16, 32>}, {pipeline_mode = #tpu.pipeline_mode<synchronous>, transform_indices = @transform_1, window_bounds = array<i64: 1, 32>}, {pipeline_mode = #tpu.pipeline_mode<synchronous>, transform_indices = @transform_2, window_bounds = array<i64: 1, 32>}, {transform_indices = @transform_3, window_bounds = array<i64: 32, 128>}, {transform_indices = @transform_4, window_bounds = array<i64: 16, 128>}]} {
    %c0 = arith.constant 0 : index
    %c0_0 = arith.constant 0 : index
    %0 = vector.load %arg2[%c0, %c0_0] : memref<16x32xf32, #tpu.memory_space<vmem>>, vector<16x32xf32>
    %cst = arith.constant dense<0.000000e+00> : vector<16xf32>
    %1 = vector.multi_reduction <add>, %0, %cst [1] : vector<16x32xf32> to vector<16xf32>
    %2 = vector.shape_cast %1 : vector<16xf32> to vector<16x1xf32>
    %cst_1 = arith.constant 3.200000e+01 : f32
    %3 = vector.broadcast %cst_1 : f32 to vector<16x1xf32>
    %4 = arith.divf %2, %3 : vector<16x1xf32>
    %5 = vector.broadcast %4 : vector<16x1xf32> to vector<16x32xf32>
    %6 = arith.subf %0, %5 : vector<16x32xf32>
    %7 = arith.mulf %6, %6 : vector<16x32xf32>
    %cst_2 = arith.constant dense<0.000000e+00> : vector<16xf32>
    %8 = vector.multi_reduction <add>, %7, %cst_2 [1] : vector<16x32xf32> to vector<16xf32>
    %9 = vector.shape_cast %8 : vector<16xf32> to vector<16x1xf32>
    %cst_3 = arith.constant 3.200000e+01 : f32
    %10 = vector.broadcast %cst_3 : f32 to vector<16x1xf32>
    %11 = arith.divf %9, %10 : vector<16x1xf32>
    %cst_4 = arith.constant 9.99999974E-6 : f32
    %12 = vector.broadcast %cst_4 : f32 to vector<16x1xf32>
    %13 = arith.addf %11, %12 : vector<16x1xf32>
    %14 = math.rsqrt %13 : vector<16x1xf32>
    %15 = vector.broadcast %14 : vector<16x1xf32> to vector<16x32xf32>
    %16 = arith.mulf %6, %15 : vector<16x32xf32>
    %c0_5 = arith.constant 0 : index
    %c0_6 = arith.constant 0 : index
    %17 = vector.load %arg3[%c0_5, %c0_6] : memref<1x32xf32, #tpu.memory_space<vmem>>, vector<1x32xf32>
    %18 = vector.broadcast %17 : vector<1x32xf32> to vector<16x32xf32>
    %19 = arith.mulf %16, %18 : vector<16x32xf32>
    %c0_7 = arith.constant 0 : index
    %c0_8 = arith.constant 0 : index
    %20 = vector.load %arg4[%c0_7, %c0_8] : memref<1x32xf32, #tpu.memory_space<vmem>>, vector<1x32xf32>
    %21 = vector.broadcast %20 : vector<1x32xf32> to vector<16x32xf32>
    %22 = arith.addf %19, %21 : vector<16x32xf32>
    %c0_9 = arith.constant 0 : index
    %c0_10 = arith.constant 0 : index
    %23 = vector.load %arg5[%c0_9, %c0_10] : memref<32x128xf32, #tpu.memory_space<vmem>>, vector<32x128xf32>
    %cst_11 = arith.constant dense<0.000000e+00> : vector<16x128xf32>
    %24 = tpu.matmul %22, %23, %cst_11 {dimension_numbers = #tpu.dot_dimension_numbers<[1], [0], [0], [1], [0, 0, 1, 1], [], []>} : vector<16x32xf32>, vector<32x128xf32>, vector<16x128xf32> -> vector<16x128xf32>
    %c0_12 = arith.constant 0 : index
    %c0_13 = arith.constant 0 : index
    %25 = vector.load %arg6[%c0_12, %c0_13] : memref<16x128xf32, #tpu.memory_space<vmem>>, vector<16x128xf32>
    tpu.vector_store %arg6[%c0_12, %c0_13], %24 {strides = array<i32>} : memref<16x128xf32, #tpu.memory_space<vmem>>, vector<16x128xf32>,
    return
  }
  func.func @transform_0(%arg0: i32, %arg1: i32) -> (i32, i32) {
    %c0_i32 = arith.constant 0 : i32
    %c0_i32_0 = arith.constant 0 : i32
    return %arg0, %c0_i32 : i32, i32
  }
  func.func @transform_1(%arg0: i32, %arg1: i32) -> (i32, i32) {
    %c0_i32 = arith.constant 0 : i32
    %c0_i32_0 = arith.constant 0 : i32
    %c0_i32_1 = arith.constant 0 : i32
    return %c0_i32, %c0_i32_0 : i32, i32
  }
  func.func @transform_2(%arg0: i32, %arg1: i32) -> (i32, i32) {
    %c0_i32 = arith.constant 0 : i32
    %c0_i32_0 = arith.constant 0 : i32
    %c0_i32_1 = arith.constant 0 : i32
    return %c0_i32, %c0_i32_0 : i32, i32
  }
  func.func @transform_3(%arg0: i32, %arg1: i32) -> (i32, i32) {
    %c0_i32 = arith.constant 0 : i32
    %c0_i32_0 = arith.constant 0 : i32
    return %c0_i32, %arg1 : i32, i32
  }
  func.func @transform_4(%arg0: i32, %arg1: i32) -> (i32, i32) {
    %c0_i32 = arith.constant 0 : i32
    return %arg0, %arg1 : i32, i32
  }
}

</mosaic_0001>

<bundles_post_ra>
// kernel: tpu_custom_call.1
= control target key start
LH: loop header
LB: loop body
LE: loop exit
PB: predicated region body
PF: predicated region fallthrough
CT: control target
= control target key end

     0   :  { %9 = vsyncpa [#allocation3], 0  ;;  %s396_s0 = inlined_call_operand.hbm [shape: f32[16,32], index: 0, kind: input, shape index: {}]   ;;  %s397_s1 = inlined_call_operand.vmem [shape: f32[1,32], index: 1, kind: input, shape index: {}]   ;;  %s398_s2 = inlined_call_operand.vmem [shape: f32[1,32], index: 2, kind: input, shape index: {}]   ;;  %s399_s3 = inlined_call_operand.hbm [shape: f32[32,128], index: 3, kind: input, shape index: {}]   ;;  %s400_s4 = inlined_call_operand.hbm [shape: f32[16,128], index: 4, kind: output, shape index: {}]  }
   0x1   :  { %10 = vsyncpa [#allocation6], 0 }
   0x2   :  { %11 = vsyncpa [#allocation4], 0  ;;  %s309_s15 = smov [#allocation2]   ;;  %s237_s19 = scalar_lea.hbm %s396_s0, 256 }
   0x3   :  { %s17_s16 = sshll.u32 %s309_s15, 4  ;;  %p238_p0 = scmp.ne.s32.totalorder %s396_s0, %s237_s19  ;;  %s18_s16 = int_to_ptr.vmem [resolvable:$true] %s17_s16 }
   0x4   :  { %p241_p1 = scmp.lt.u32.totalorder %s237_s19, %s396_s0 }
   0x6   :  { %p243_p2 = pnand %p241_p1, %p238_p0 }
   0x8   :  { %246 = shalt.err (!%p243_p2)
}
   0x9   :  { %s247_s24 = scalar_lea.vmem %s18_s16, 256  ;;  %p252_p4 = scmp.lt.s32.totalorder %s18_s16, %s18_s16 }
   0xa   :  { %p248_p3 = scmp.ne.s32.totalorder %s18_s16, %s247_s24  ;;  %p253_p5 = scmp.lt.s32.totalorder %s247_s24, %s247_s24 }
   0xc   :  { %p254_p6 = por %p253_p5, %p252_p4 }
   0xe   :  { %p255_p7 = pnand %p254_p6, %p248_p3 }
  0x10   :  { %258 = shalt.err (!%p255_p7)
}
  0x11   :  { %s310_s25 = smov 128   ;;  %s311_s26 = smov 8  }
  0x12   :  { %23 = dma.hbm_to_vmem [thread:$0]  %s396_s0, 256, %s18_s16, [#allocation3], %s310_s25, %s310_s25, %s311_s26  }
  0x13   :  { %s312_s29 = smov [#allocation5]   ;;  %s259_s7 = scalar_lea.hbm %s399_s3, 512 }
  0x14   :  { %s33_s30 = sshll.u32 %s312_s29, 4  ;;  %p260_p8 = scmp.ne.s32.totalorder %s399_s3, %s259_s7  ;;  %s34_s30 = int_to_ptr.vmem [resolvable:$true] %s33_s30 }
  0x15   :  { %p263_p9 = scmp.lt.u32.totalorder %s259_s7, %s399_s3 }
  0x17   :  { %p265_p10 = pnand %p263_p9, %p260_p8 }
  0x19   :  { %268 = shalt.err (!%p265_p10)
}
  0x1a   :  { %s269_s12 = scalar_lea.vmem %s34_s30, 512  ;;  %p274_p12 = scmp.lt.s32.totalorder %s34_s30, %s34_s30 }
  0x1b   :  { %p270_p11 = scmp.ne.s32.totalorder %s34_s30, %s269_s12  ;;  %p275_p13 = scmp.lt.s32.totalorder %s269_s12, %s269_s12 }
  0x1d   :  { %p276_p0 = por %p275_p13, %p274_p12 }
  0x1f   :  { %p277_p1 = pnand %p276_p0, %p270_p11 }
  0x21   :  { %280 = shalt.err (!%p277_p1)
}
  0x22   :  { %39 = dma.hbm_to_vmem [thread:$0]  %s399_s3, 512, %s34_s30, [#allocation6], %s310_s25, %s310_s25, %s311_s26  }
  0x23   :  { %303 = dma.done.wait [#allocation3], 256  }
  0x24   :  { %304 = vsyncadd [#allocation3], 4294967040 }
  0x25   :  { %305 = dma.done.wait [#allocation6], 512  }
  0x26   :  { %306 = vsyncadd [#allocation6], 4294966784  ;;  %vm48_vm0 = vcmask 261120   ;;  %v46_v0 = vld [vmem:[#allocation2] sm:$0xff]  ;;  %v47_v1 = vld [vmem:[#allocation2 + $0x8] sm:$0xff]  ;;  %s313_s17 = smov [#allocation7]  }
  0x27   :  { %v49_v2 = vsel %vm48_vm0, %v46_v0, 0.0  ;;  %v52_v3 = vsel %vm48_vm0, %v47_v1, 0.0  ;;  %v94_v14 = vld [vmem:[#allocation5] sm:$0xff]  ;;  %v95_v15 = vld [vmem:[#allocation5 + $0x8] sm:$0xff]  ;;  %v96_v16 = vld [vmem:[#allocation5 + $0x10] sm:$0xff]  ;;  %s186_s18 = sshll.u32 %s313_s17, 4  ;;  %s187_s18 = int_to_ptr.vmem [resolvable:$true] %s186_s18 }
  0x28   :  { %50 = vadd.xlane.f32.xlu0 %v49_v2  ;;  %v220_v17 = vpack.c.bf16 %v95_v15, %v94_v14  ;;  %v97_v18 = vld [vmem:[#allocation5 + $0x18] sm:$0xff]  ;;  %v199_v27 = vld [vmem:[%s397_s1] ss:$0 sm:$0xff]  ;;  %s281_s1 = scalar_lea.vmem %s187_s18, 256  ;;  %p286_p3 = scmp.lt.s32.totalorder %s187_s18, %s187_s18 }
  0x29   :  { %v224_v19 = vpack.c.bf16 %v97_v18, %v96_v16  ;;  %v200_v29 = vld [vmem:[%s398_s2] ss:$0 sm:$0xff]  ;;  %p282_p2 = scmp.ne.s32.totalorder %s187_s18, %s281_s1  ;;  %p287_p4 = scmp.lt.s32.totalorder %s281_s1, %s281_s1 }
  0x2a   :  { %221 = vmatprep.subr.bf16.mxu0 %v220_v17 }
  0x2b   :  { %223 = vmatpush3.bf16.msra.mxu0 %v220_v17  ;;  %p288_p5 = por %p287_p4, %p286_p3 }
  0x2c   :  { %53 = vadd.xlane.f32.xlu0 %v52_v3  ;;  %225 = vmatprep.subr.bf16.mxu0 %v224_v19 }
  0x2d   :  { %p289_p6 = pnand %p288_p5, %p282_p2 }
  0x2f   :  { %227 = vmatpush3.bf16.msra.mxu0 %v224_v19 }
  0xb5   :  { %v51_v4 = vpop.xlane.xlu0 %50 }
  0xb6   :  { %v56_v5 = vmul.f32 0.03125, %v51_v4 }
  0xb8   :  { %v58_v6 = vsub.f32 %v46_v0, %v56_v5 }
  0xb9   :  { %v54_v7 = vpop.xlane.xlu0 %53 }
  0xba   :  { %v57_v8 = vmul.f32 0.03125, %v54_v7  ;;  %v60_v9 = vmul.f32 %v58_v6, %v58_v6 }
  0xbc   :  { %v59_v10 = vsub.f32 %v47_v1, %v57_v8  ;;  %v62_v11 = vsel %vm48_vm0, %v60_v9, 0.0 }
  0xbd   :  { %63 = vadd.xlane.f32.xlu1 %v62_v11 }
  0xbe   :  { %v61_v12 = vmul.f32 %v59_v10, %v59_v10 }
  0xc0   :  { %v65_v13 = vsel %vm48_vm0, %v61_v12, 0.0 }
  0xc1   :  { %66 = vadd.xlane.f32.xlu1 %v65_v13 }
 0x14a   :  { %v64_v20 = vpop.xlane.xlu1 %63 }
 0x14b   :  { %v68_v21 = vmul.f32 0.03125, %v64_v20 }
 0x14d   :  { %v70_v22 = vadd.f32 1e-05, %v68_v21 }
 0x14e   :  { %v67_v23 = vpop.xlane.xlu1 %66 }
 0x14f   :  { %233 = vrsqrt.f32 %v70_v22  ;;  %v69_v24 = vmul.f32 0.03125, %v67_v23 }
 0x151   :  { %v71_v25 = vadd.f32 1e-05, %v69_v24 }
 0x153   :  { %235 = vrsqrt.f32 %v71_v25 }
 0x159   :  { %v234_v26 = vpop.eup %233 }
 0x15a   :  { %v74_v28 = vmul.f32 %v234_v26, %v58_v6 }
 0x15c   :  { %v83_v30 = vmul.f32 %v199_v27, %v74_v28 }
 0x15d   :  { %v236_v31 = vpop.eup %235 }
 0x15e   :  { %v75_v32 = vmul.f32 %v236_v31, %v59_v10  ;;  %v92_v33 = vadd.f32 %v200_v29, %v83_v30 }
 0x160   :  { %v84_v34 = vmul.f32 %v199_v27, %v75_v32  ;;  %217 = vmatprep.mubr.msk.f32.mxu0 %vm48_vm0, %v92_v33 }
 0x162   :  { %v93_v35 = vadd.f32 %v200_v29, %v84_v34 }
 0x164   :  { %218 = vmatmul.mubr.msk.f32.vlgmr.msra.gmra.mrb[0].mxu0 %vm48_vm0, %v93_v35 }
 0x237   :  { %v219_v36 = vpop.f32.mrb[0].mxu0 }
 0x238   :  { %180 = vst [vmem:[#allocation7 + $0x8] sm:$0xff] %v219_v36  ;;  %v170_v37 = vpop.f32.mrb[1].mxu0 }
 0x239   :  { %179 = vst [vmem:[#allocation7] sm:$0xff] %v170_v37 }
 0x23a   :  { %292 = shalt.err (!%p289_p6)
}
 0x23b   :  { %s293_s20 = scalar_lea.hbm %s400_s4, 256 }
 0x23c   :  { %p294_p7 = scmp.ne.s32.totalorder %s400_s4, %s293_s20  ;;  %p297_p8 = scmp.lt.u32.totalorder %s293_s20, %s400_s4 }
 0x23e   :  { %p299_p9 = pnand %p297_p8, %p294_p7 }
 0x240   :  { %302 = shalt.err (!%p299_p9)
}
 0x241   :  { %192 = dma.vmem_to_hbm [thread:$0]  %s187_s18, 256, %s400_s4, [#allocation4], %s310_s25, %s310_s25, %s311_s26  }
 0x242   :  { %307 = dma.done.wait [#allocation4], 256  }
 0x243   :  { %308 = vsyncadd [#allocation4], 4294967040 }
 0x244   :  { %196 = vsyncpa [#allocation3], 1 }
 0x245   :  { %197 = vsyncpa [#allocation6], 1 }
 0x246   :  { %198 = vsyncpa [#allocation4], 1 }

</bundles_post_ra>
